<compile_context>
chip_gen: v7x
topology: tpu7x:2x2x1
jax: 0.10.0
libtpu: 0.0.40
codegen_flags: <defaults>
</compile_context>

<pallas_src>
import functools

import jax
import jax.numpy as jnp
from jax.experimental import pallas as pl
from jax.experimental.pallas import tpu as pltpu

LANE = 128     # vreg lane width  (last dim granularity)
SUBLANE = 8    # vreg sublane width (second-to-last dim granularity)


def _round_up(x, m):
    return ((x + m - 1) // m) * m


def _mlp_kernel(x_ref,
                w1, b1, w2, b2, w3, b3, w4, b4, w5, b5, w6, b6, w7, b7,
                out_ref):
    """One batch tile: all 7 layers fused, weights resident in VMEM."""
    h = x_ref[...]  # bf16 (TM, F_pad)

    def dense_relu(h_bf16, w_ref, b_ref):
        # bf16 x bf16 -> f32 accumulate on the MXU; bias + ReLU in f32 (VPU);
        # cast back to bf16 for the next MXU op.
        y = jnp.dot(h_bf16, w_ref[...], preferred_element_type=jnp.float32)
        y = y + b_ref[...]
        return jnp.maximum(y, 0.0).astype(jnp.bfloat16)

    h = dense_relu(h, w1, b1)   # fc1 + relu (+ identity dropout)
    h = dense_relu(h, w2, b2)   # fc2
    h = dense_relu(h, w3, b3)   # fc3
    h = dense_relu(h, w4, b4)   # fc4
    h = dense_relu(h, w5, b5)   # fc5
    h = dense_relu(h, w6, b6)   # fc6

    # output layer: no ReLU; lane-dense (TM, 128) f32 store
    out = jnp.dot(h, w7[...], preferred_element_type=jnp.float32) + b7[...]
    out_ref[...] = out.astype(out_ref.dtype)


def my_awesome_model_forward(x, params, *, tm_max=256):
    """x: [B, C, H, W] (any float dtype). params: list of (W[in,out] f32, b[1,out] f32)."""
    B = x.shape[0]
    x2d = x.reshape(B, -1).astype(jnp.float32)     # x.view(B, -1); .to(float32)
    F = x2d.shape[1]

    # ---- pad weights/biases to lane-dense shapes; weights -> bf16, biases -> f32 ----
    padded = []
    k_pad = _round_up(F, LANE)
    for w, b in params:
        k, n = w.shape
        n_pad = _round_up(n, LANE)
        w_p = (jnp.zeros((k_pad, n_pad), jnp.float32)
               .at[:k, :n].set(w)).astype(jnp.bfloat16)
        b_p = jnp.zeros((1, n_pad), jnp.float32).at[:, :n].set(b.reshape(1, -1))
        padded.append((w_p, b_p))
        k_pad = n_pad

    out_features = params[-1][0].shape[1]
    out_pad = padded[-1][0].shape[1]
    f_pad = padded[0][0].shape[0]

    # ---- batch tiling: TM multiple of 8, capped at tm_max; pad B to a tile multiple ----
    tm = min(tm_max, _round_up(B, SUBLANE))
    b_pad = _round_up(B, tm)
    x_p = (jnp.zeros((b_pad, f_pad), jnp.float32)
           .at[:B, :F].set(x2d)).astype(jnp.bfloat16)   # halve x DMA bytes too

    flat_params = []
    in_specs = [pl.BlockSpec((tm, f_pad), lambda i: (i, 0))]       # batch-tiled input
    for w_p, b_p in padded:
        flat_params.extend([w_p, b_p])
        # constant index_map -> same block every step -> stays VMEM-resident
        in_specs.append(pl.BlockSpec(w_p.shape, lambda i: (0, 0)))
        in_specs.append(pl.BlockSpec(b_p.shape, lambda i: (0, 0)))

    grid = (b_pad // tm,)

    # advisory cost estimate (kernel is tiny / launch-latency bound at small B)
    flops = 2 * b_pad * sum(int(w.shape[0]) * int(w.shape[1]) for w, _ in padded)
    bytes_accessed = (x_p.size * 2 + b_pad * out_pad * 4
                      + sum(int(w.size) * 2 + int(b.size) * 4 for w, b in padded))
    cost = pl.CostEstimate(flops=flops, transcendentals=0,
                           bytes_accessed=bytes_accessed)

    out = pl.pallas_call(
        _mlp_kernel,
        out_shape=jax.ShapeDtypeStruct((b_pad, out_pad), jnp.float32),
        grid=grid,
        in_specs=in_specs,
        out_specs=pl.BlockSpec((tm, out_pad), lambda i: (i, 0)),
        compiler_params=pltpu.CompilerParams(
            dimension_semantics=("parallel",)),   # megacore sharding on v7x
        cost_estimate=cost,
    )(x_p, *flat_params)

    return out[:B, :out_features]


def reference_forward(x, params):
    """Pure-JAX reference using the same bf16-weight / f32-accumulate recipe."""
    B = x.shape[0]
    h = x.reshape(B, -1).astype(jnp.float32)
    n_layers = len(params)
    for idx, (w, b) in enumerate(params):
        y = jnp.dot(h.astype(jnp.bfloat16), w.astype(jnp.bfloat16),
                    preferred_element_type=jnp.float32) + b.reshape(1, -1)
        h = jnp.maximum(y, 0.0) if idx < n_layers - 1 else y
    return h


def init_params(key, input_size, hidden_layers, output_size):
    """Deterministic PyTorch-Linear-like init (uniform(-1/sqrt(fan_in), 1/sqrt(fan_in)))."""
    sizes = [input_size] + list(hidden_layers) + [output_size]
    params = []
    for i in range(len(sizes) - 1):
        fan_in, fan_out = sizes[i], sizes[i + 1]
        key, kw, kb = jax.random.split(key, 3)
        bound = 1.0 / (fan_in ** 0.5)
        # stored transposed: [in, out], so kernel computes h @ W + b
        w = jax.random.uniform(kw, (fan_in, fan_out), jnp.float32, -bound, bound)
        b = jax.random.uniform(kb, (1, fan_out), jnp.float32, -bound, bound)
        params.append((w, b))
    return params


if __name__ == "__main__":
    # Small, module-consistent shapes: x = [B=24, C=1, H=8, W=8] -> input_size = 64
    B, C, H, W = 24, 1, 8, 8
    input_size = C * H * W                           # 64 (padded to 128 internally)
    hidden_layers = [128, 128, 128, 128, 128, 128]   # fc1..fc6
    output_size = 10                                 # padded to 128 internally

    key = jax.random.PRNGKey(0)
    key, kx = jax.random.split(key)
    x = jax.random.normal(kx, (B, C, H, W), dtype=jnp.float32)

    params = init_params(key, input_size, hidden_layers, output_size)

    # tm_max=8 here so the small test exercises a multi-step batch grid (grid=(3,));
    # production default is tm_max=256.
    fwd = jax.jit(functools.partial(my_awesome_model_forward,
                                    params=params, tm_max=8))
    out = fwd(x)
    jax.block_until_ready(out)

    assert out.shape == (B, output_size), out.shape
    assert out.dtype == jnp.float32, out.dtype

    ref = reference_forward(x, params)
    assert jnp.all(jnp.isfinite(out))
    assert jnp.allclose(out, ref, rtol=2e-2, atol=2e-2), \
        float(jnp.max(jnp.abs(out - ref)))

    print("KERNEL_OK")
</pallas_src>

<mosaic_0001>
module attributes {stable_mosaic.version = 11 : i64} {
  func.func @_mlp_kernel(%arg0: i32, %arg1: memref<8x128xbf16, #tpu.memory_space<vmem>>, %arg2: memref<128x128xbf16, #tpu.memory_space<vmem>>, %arg3: memref<1x128xf32, #tpu.memory_space<vmem>>, %arg4: memref<128x128xbf16, #tpu.memory_space<vmem>>, %arg5: memref<1x128xf32, #tpu.memory_space<vmem>>, %arg6: memref<128x128xbf16, #tpu.memory_space<vmem>>, %arg7: memref<1x128xf32, #tpu.memory_space<vmem>>, %arg8: memref<128x128xbf16, #tpu.memory_space<vmem>>, %arg9: memref<1x128xf32, #tpu.memory_space<vmem>>, %arg10: memref<128x128xbf16, #tpu.memory_space<vmem>>, %arg11: memref<1x128xf32, #tpu.memory_space<vmem>>, %arg12: memref<128x128xbf16, #tpu.memory_space<vmem>>, %arg13: memref<1x128xf32, #tpu.memory_space<vmem>>, %arg14: memref<128x128xbf16, #tpu.memory_space<vmem>>, %arg15: memref<1x128xf32, #tpu.memory_space<vmem>>, %arg16: memref<8x128xf32, #tpu.memory_space<vmem>>) attributes {dimension_semantics = [#tpu.dimension_semantics<parallel>], iteration_bounds = array<i64: 3>, scalar_prefetch = 0 : i64, scratch_operands = 0 : i64, tpu.core_type = #tpu.core_type<tc>, window_params = [{transform_indices = @transform_0, window_bounds = array<i64: 8, 128>}, {pipeline_mode = #tpu.pipeline_mode<synchronous>, transform_indices = @transform_1, window_bounds = array<i64: 128, 128>}, {pipeline_mode = #tpu.pipeline_mode<synchronous>, transform_indices = @transform_2, window_bounds = array<i64: 1, 128>}, {pipeline_mode = #tpu.pipeline_mode<synchronous>, transform_indices = @transform_3, window_bounds = array<i64: 128, 128>}, {pipeline_mode = #tpu.pipeline_mode<synchronous>, transform_indices = @transform_4, window_bounds = array<i64: 1, 128>}, {pipeline_mode = #tpu.pipeline_mode<synchronous>, transform_indices = @transform_5, window_bounds = array<i64: 128, 128>}, {pipeline_mode = #tpu.pipeline_mode<synchronous>, transform_indices = @transform_6, window_bounds = array<i64: 1, 128>}, {pipeline_mode = #tpu.pipeline_mode<synchronous>, transform_indices = @transform_7, window_bounds = array<i64: 128, 128>}, {pipeline_mode = #tpu.pipeline_mode<synchronous>, transform_indices = @transform_8, window_bounds = array<i64: 1, 128>}, {pipeline_mode = #tpu.pipeline_mode<synchronous>, transform_indices = @transform_9, window_bounds = array<i64: 128, 128>}, {pipeline_mode = #tpu.pipeline_mode<synchronous>, transform_indices = @transform_10, window_bounds = array<i64: 1, 128>}, {pipeline_mode = #tpu.pipeline_mode<synchronous>, transform_indices = @transform_11, window_bounds = array<i64: 128, 128>}, {pipeline_mode = #tpu.pipeline_mode<synchronous>, transform_indices = @transform_12, window_bounds = array<i64: 1, 128>}, {pipeline_mode = #tpu.pipeline_mode<synchronous>, transform_indices = @transform_13, window_bounds = array<i64: 128, 128>}, {pipeline_mode = #tpu.pipeline_mode<synchronous>, transform_indices = @transform_14, window_bounds = array<i64: 1, 128>}, {transform_indices = @transform_15, window_bounds = array<i64: 8, 128>}]} {
    %c0 = arith.constant 0 : index
    %c0_0 = arith.constant 0 : index
    %0 = vector.load %arg1[%c0, %c0_0] : memref<8x128xbf16, #tpu.memory_space<vmem>>, vector<8x128xbf16>
    %c0_1 = arith.constant 0 : index
    %c0_2 = arith.constant 0 : index
    %1 = vector.load %arg2[%c0_1, %c0_2] : memref<128x128xbf16, #tpu.memory_space<vmem>>, vector<128x128xbf16>
    %cst = arith.constant dense<0.000000e+00> : vector<8x128xf32>
    %2 = tpu.matmul %0, %1, %cst {dimension_numbers = #tpu.dot_dimension_numbers<[1], [0], [0], [1], [0, 0, 1, 1], [], []>} : vector<8x128xbf16>, vector<128x128xbf16>, vector<8x128xf32> -> vector<8x128xf32>
    %c0_3 = arith.constant 0 : index
    %c0_4 = arith.constant 0 : index
    %3 = vector.load %arg3[%c0_3, %c0_4] : memref<1x128xf32, #tpu.memory_space<vmem>>, vector<1x128xf32>
    %4 = vector.broadcast %3 : vector<1x128xf32> to vector<8x128xf32>
    %5 = arith.addf %2, %4 : vector<8x128xf32>
    %cst_5 = arith.constant 0.000000e+00 : f32
    %6 = vector.broadcast %cst_5 : f32 to vector<8x128xf32>
    %7 = arith.maximumf %5, %6 : vector<8x128xf32>
    %8 = arith.truncf %7 : vector<8x128xf32> to vector<8x128xbf16>
    %c0_6 = arith.constant 0 : index
    %c0_7 = arith.constant 0 : index
    %9 = vector.load %arg4[%c0_6, %c0_7] : memref<128x128xbf16, #tpu.memory_space<vmem>>, vector<128x128xbf16>
    %cst_8 = arith.constant dense<0.000000e+00> : vector<8x128xf32>
    %10 = tpu.matmul %8, %9, %cst_8 {dimension_numbers = #tpu.dot_dimension_numbers<[1], [0], [0], [1], [0, 0, 1, 1], [], []>} : vector<8x128xbf16>, vector<128x128xbf16>, vector<8x128xf32> -> vector<8x128xf32>
    %c0_9 = arith.constant 0 : index
    %c0_10 = arith.constant 0 : index
    %11 = vector.load %arg5[%c0_9, %c0_10] : memref<1x128xf32, #tpu.memory_space<vmem>>, vector<1x128xf32>
    %12 = vector.broadcast %11 : vector<1x128xf32> to vector<8x128xf32>
    %13 = arith.addf %10, %12 : vector<8x128xf32>
    %cst_11 = arith.constant 0.000000e+00 : f32
    %14 = vector.broadcast %cst_11 : f32 to vector<8x128xf32>
    %15 = arith.maximumf %13, %14 : vector<8x128xf32>
    %16 = arith.truncf %15 : vector<8x128xf32> to vector<8x128xbf16>
    %c0_12 = arith.constant 0 : index
    %c0_13 = arith.constant 0 : index
    %17 = vector.load %arg6[%c0_12, %c0_13] : memref<128x128xbf16, #tpu.memory_space<vmem>>, vector<128x128xbf16>
    %cst_14 = arith.constant dense<0.000000e+00> : vector<8x128xf32>
    %18 = tpu.matmul %16, %17, %cst_14 {dimension_numbers = #tpu.dot_dimension_numbers<[1], [0], [0], [1], [0, 0, 1, 1], [], []>} : vector<8x128xbf16>, vector<128x128xbf16>, vector<8x128xf32> -> vector<8x128xf32>
    %c0_15 = arith.constant 0 : index
    %c0_16 = arith.constant 0 : index
    %19 = vector.load %arg7[%c0_15, %c0_16] : memref<1x128xf32, #tpu.memory_space<vmem>>, vector<1x128xf32>
    %20 = vector.broadcast %19 : vector<1x128xf32> to vector<8x128xf32>
    %21 = arith.addf %18, %20 : vector<8x128xf32>
    %cst_17 = arith.constant 0.000000e+00 : f32
    %22 = vector.broadcast %cst_17 : f32 to vector<8x128xf32>
    %23 = arith.maximumf %21, %22 : vector<8x128xf32>
    %24 = arith.truncf %23 : vector<8x128xf32> to vector<8x128xbf16>
    %c0_18 = arith.constant 0 : index
    %c0_19 = arith.constant 0 : index
    %25 = vector.load %arg8[%c0_18, %c0_19] : memref<128x128xbf16, #tpu.memory_space<vmem>>, vector<128x128xbf16>
    %cst_20 = arith.constant dense<0.000000e+00> : vector<8x128xf32>
    %26 = tpu.matmul %24, %25, %cst_20 {dimension_numbers = #tpu.dot_dimension_numbers<[1], [0], [0], [1], [0, 0, 1, 1], [], []>} : vector<8x128xbf16>, vector<128x128xbf16>, vector<8x128xf32> -> vector<8x128xf32>
    %c0_21 = arith.constant 0 : index
    %c0_22 = arith.constant 0 : index
    %27 = vector.load %arg9[%c0_21, %c0_22] : memref<1x128xf32, #tpu.memory_space<vmem>>, vector<1x128xf32>
    %28 = vector.broadcast %27 : vector<1x128xf32> to vector<8x128xf32>
    %29 = arith.addf %26, %28 : vector<8x128xf32>
    %cst_23 = arith.constant 0.000000e+00 : f32
    %30 = vector.broadcast %cst_23 : f32 to vector<8x128xf32>
    %31 = arith.maximumf %29, %30 : vector<8x128xf32>
    %32 = arith.truncf %31 : vector<8x128xf32> to vector<8x128xbf16>
    %c0_24 = arith.constant 0 : index
    %c0_25 = arith.constant 0 : index
    %33 = vector.load %arg10[%c0_24, %c0_25] : memref<128x128xbf16, #tpu.memory_space<vmem>>, vector<128x128xbf16>
    %cst_26 = arith.constant dense<0.000000e+00> : vector<8x128xf32>
    %34 = tpu.matmul %32, %33, %cst_26 {dimension_numbers = #tpu.dot_dimension_numbers<[1], [0], [0], [1], [0, 0, 1, 1], [], []>} : vector<8x128xbf16>, vector<128x128xbf16>, vector<8x128xf32> -> vector<8x128xf32>
    %c0_27 = arith.constant 0 : index
    %c0_28 = arith.constant 0 : index
    %35 = vector.load %arg11[%c0_27, %c0_28] : memref<1x128xf32, #tpu.memory_space<vmem>>, vector<1x128xf32>
    %36 = vector.broadcast %35 : vector<1x128xf32> to vector<8x128xf32>
    %37 = arith.addf %34, %36 : vector<8x128xf32>
    %cst_29 = arith.constant 0.000000e+00 : f32
    %38 = vector.broadcast %cst_29 : f32 to vector<8x128xf32>
    %39 = arith.maximumf %37, %38 : vector<8x128xf32>
    %40 = arith.truncf %39 : vector<8x128xf32> to vector<8x128xbf16>
    %c0_30 = arith.constant 0 : index
    %c0_31 = arith.constant 0 : index
    %41 = vector.load %arg12[%c0_30, %c0_31] : memref<128x128xbf16, #tpu.memory_space<vmem>>, vector<128x128xbf16>
    %cst_32 = arith.constant dense<0.000000e+00> : vector<8x128xf32>
    %42 = tpu.matmul %40, %41, %cst_32 {dimension_numbers = #tpu.dot_dimension_numbers<[1], [0], [0], [1], [0, 0, 1, 1], [], []>} : vector<8x128xbf16>, vector<128x128xbf16>, vector<8x128xf32> -> vector<8x128xf32>
    %c0_33 = arith.constant 0 : index
    %c0_34 = arith.constant 0 : index
    %43 = vector.load %arg13[%c0_33, %c0_34] : memref<1x128xf32, #tpu.memory_space<vmem>>, vector<1x128xf32>
    %44 = vector.broadcast %43 : vector<1x128xf32> to vector<8x128xf32>
    %45 = arith.addf %42, %44 : vector<8x128xf32>
    %cst_35 = arith.constant 0.000000e+00 : f32
    %46 = vector.broadcast %cst_35 : f32 to vector<8x128xf32>
    %47 = arith.maximumf %45, %46 : vector<8x128xf32>
    %48 = arith.truncf %47 : vector<8x128xf32> to vector<8x128xbf16>
    %c0_36 = arith.constant 0 : index
    %c0_37 = arith.constant 0 : index
    %49 = vector.load %arg14[%c0_36, %c0_37] : memref<128x128xbf16, #tpu.memory_space<vmem>>, vector<128x128xbf16>
    %cst_38 = arith.constant dense<0.000000e+00> : vector<8x128xf32>
    %50 = tpu.matmul %48, %49, %cst_38 {dimension_numbers = #tpu.dot_dimension_numbers<[1], [0], [0], [1], [0, 0, 1, 1], [], []>} : vector<8x128xbf16>, vector<128x128xbf16>, vector<8x128xf32> -> vector<8x128xf32>
    %c0_39 = arith.constant 0 : index
    %c0_40 = arith.constant 0 : index
    %51 = vector.load %arg15[%c0_39, %c0_40] : memref<1x128xf32, #tpu.memory_space<vmem>>, vector<1x128xf32>
    %52 = vector.broadcast %51 : vector<1x128xf32> to vector<8x128xf32>
    %53 = arith.addf %50, %52 : vector<8x128xf32>
    %c0_41 = arith.constant 0 : index
    %c0_42 = arith.constant 0 : index
    %54 = vector.load %arg16[%c0_41, %c0_42] : memref<8x128xf32, #tpu.memory_space<vmem>>, vector<8x128xf32>
    tpu.vector_store %arg16[%c0_41, %c0_42], %53 {strides = array<i32>} : memref<8x128xf32, #tpu.memory_space<vmem>>, vector<8x128xf32>,
    return
  }
  func.func @transform_0(%arg0: i32) -> (i32, i32) {
    %c0_i32 = arith.constant 0 : i32
    %c0_i32_0 = arith.constant 0 : i32
    return %arg0, %c0_i32 : i32, i32
  }
  func.func @transform_1(%arg0: i32) -> (i32, i32) {
    %c0_i32 = arith.constant 0 : i32
    %c0_i32_0 = arith.constant 0 : i32
    %c0_i32_1 = arith.constant 0 : i32
    return %c0_i32, %c0_i32_0 : i32, i32
  }
  func.func @transform_2(%arg0: i32) -> (i32, i32) {
    %c0_i32 = arith.constant 0 : i32
    %c0_i32_0 = arith.constant 0 : i32
    %c0_i32_1 = arith.constant 0 : i32
    return %c0_i32, %c0_i32_0 : i32, i32
  }
  func.func @transform_3(%arg0: i32) -> (i32, i32) {
    %c0_i32 = arith.constant 0 : i32
    %c0_i32_0 = arith.constant 0 : i32
    %c0_i32_1 = arith.constant 0 : i32
    return %c0_i32, %c0_i32_0 : i32, i32
  }
  func.func @transform_4(%arg0: i32) -> (i32, i32) {
    %c0_i32 = arith.constant 0 : i32
    %c0_i32_0 = arith.constant 0 : i32
    %c0_i32_1 = arith.constant 0 : i32
    return %c0_i32, %c0_i32_0 : i32, i32
  }
  func.func @transform_5(%arg0: i32) -> (i32, i32) {
    %c0_i32 = arith.constant 0 : i32
    %c0_i32_0 = arith.constant 0 : i32
    %c0_i32_1 = arith.constant 0 : i32
    return %c0_i32, %c0_i32_0 : i32, i32
  }
  func.func @transform_6(%arg0: i32) -> (i32, i32) {
    %c0_i32 = arith.constant 0 : i32
    %c0_i32_0 = arith.constant 0 : i32
    %c0_i32_1 = arith.constant 0 : i32
    return %c0_i32, %c0_i32_0 : i32, i32
  }
  func.func @transform_7(%arg0: i32) -> (i32, i32) {
    %c0_i32 = arith.constant 0 : i32
    %c0_i32_0 = arith.constant 0 : i32
    %c0_i32_1 = arith.constant 0 : i32
    return %c0_i32, %c0_i32_0 : i32, i32
  }
  func.func @transform_8(%arg0: i32) -> (i32, i32) {
    %c0_i32 = arith.constant 0 : i32
    %c0_i32_0 = arith.constant 0 : i32
    %c0_i32_1 = arith.constant 0 : i32
    return %c0_i32, %c0_i32_0 : i32, i32
  }
  func.func @transform_9(%arg0: i32) -> (i32, i32) {
    %c0_i32 = arith.constant 0 : i32
    %c0_i32_0 = arith.constant 0 : i32
    %c0_i32_1 = arith.constant 0 : i32
    return %c0_i32, %c0_i32_0 : i32, i32
  }
  func.func @transform_10(%arg0: i32) -> (i32, i32) {
    %c0_i32 = arith.constant 0 : i32
    %c0_i32_0 = arith.constant 0 : i32
    %c0_i32_1 = arith.constant 0 : i32
    return %c0_i32, %c0_i32_0 : i32, i32
  }
  func.func @transform_11(%arg0: i32) -> (i32, i32) {
    %c0_i32 = arith.constant 0 : i32
    %c0_i32_0 = arith.constant 0 : i32
    %c0_i32_1 = arith.constant 0 : i32
    return %c0_i32, %c0_i32_0 : i32, i32
  }
  func.func @transform_12(%arg0: i32) -> (i32, i32) {
    %c0_i32 = arith.constant 0 : i32
    %c0_i32_0 = arith.constant 0 : i32
    %c0_i32_1 = arith.constant 0 : i32
    return %c0_i32, %c0_i32_0 : i32, i32
  }
  func.func @transform_13(%arg0: i32) -> (i32, i32) {
    %c0_i32 = arith.constant 0 : i32
    %c0_i32_0 = arith.constant 0 : i32
    %c0_i32_1 = arith.constant 0 : i32
    return %c0_i32, %c0_i32_0 : i32, i32
  }
  func.func @transform_14(%arg0: i32) -> (i32, i32) {
    %c0_i32 = arith.constant 0 : i32
    %c0_i32_0 = arith.constant 0 : i32
    %c0_i32_1 = arith.constant 0 : i32
    return %c0_i32, %c0_i32_0 : i32, i32
  }
  func.func @transform_15(%arg0: i32) -> (i32, i32) {
    %c0_i32 = arith.constant 0 : i32
    %c0_i32_0 = arith.constant 0 : i32
    return %arg0, %c0_i32 : i32, i32
  }
}

</mosaic_0001>

<bundles_post_ra>
// kernel: my_awesome_model_forward.1
= control target key start
LH: loop header
LB: loop body
LE: loop exit
PB: predicated region body
PF: predicated region fallthrough
CT: control target
= control target key end

     0   :  { %s1766_s18 = smov 0   ;;  %s2046_s0 = inlined_call_operand.vmem [shape: bf16[24,128], index: 0, kind: input, shape index: {}]   ;;  %s2047_s1 = inlined_call_operand.vmem [shape: bf16[128,128], index: 1, kind: input, shape index: {}]   ;;  %s2048_s2 = inlined_call_operand.vmem [shape: f32[1,128], index: 2, kind: input, shape index: {}]   ;;  %s2049_s3 = inlined_call_operand.vmem [shape: bf16[128,128], index: 3, kind: input, shape index: {}]   ;;  %s2050_s4 = inlined_call_operand.vmem [shape: f32[1,128], index: 4, kind: input, shape index: {}]   ;;  %s2051_s5 = inlined_call_operand.vmem [shape: bf16[128,128], index: 5, kind: input, shape index: {}]   ;;  %s2052_s6 = inlined_call_operand.vmem [shape: f32[1,128], index: 6, kind: input, shape index: {}]   ;;  %s2053_s7 = inlined_call_operand.vmem [shape: bf16[128,128], index: 7, kind: input, shape index: {}]   ;;  %s2054_s8 = inlined_call_operand.vmem [shape: f32[1,128], index: 8, kind: input, shape index: {}]   ;;  %s2055_s9 = inlined_call_operand.vmem [shape: bf16[128,128], index: 9, kind: input, shape index: {}]   ;;  %s2056_s10 = inlined_call_operand.vmem [shape: f32[1,128], index: 10, kind: input, shape index: {}]   ;;  %s2057_s11 = inlined_call_operand.vmem [shape: bf16[128,128], index: 11, kind: input, shape index: {}]   ;;  %s2058_s12 = inlined_call_operand.vmem [shape: f32[1,128], index: 12, kind: input, shape index: {}]   ;;  %s2059_s13 = inlined_call_operand.vmem [shape: bf16[128,128], index: 13, kind: input, shape index: {}]   ;;  %s2060_s14 = inlined_call_operand.vmem [shape: f32[1,128], index: 14, kind: input, shape index: {}]   ;;  %s2061_s15 = inlined_call_operand.vmem [shape: f32[24,128], index: 15, kind: output, shape index: {}]  }
   0x1 LB: > { %s1335_s19 = sadd.s32 4294967295, %s1682_s18   ;;  %p1339_p0 = scmp.ge.s32.totalorder %s1682_s18, 1  ;;  %s1682_s18 = sphi %s1766_s18, %s25_s18  }
   0x2   : > { %p436_p1 = scmp.lt.s32.totalorder %s1682_s18, 4 }
   0x4   : > { %p437_p2 = pnand %p1339_p0, %p436_p1 }
   0x5   : > { %v1620_v0 = vld [vmem:[%s2047_s1] sm:$0xff] (!%p437_p2)   ;;  %v1684_v1 = vmov (!%p437_p2), 0.0   ;;  %v1621_v2 = vld [vmem:[%s2047_s1 + $0x8] sm:$0xff] (!%p437_p2)   ;;  %vm1685_vm0 = vmmov (!%p437_p2), 0   ;;  %v1622_v3 = vld [vmem:[%s2047_s1 + $0x10] sm:$0xff] (!%p437_p2)   ;;  %p482_p3 = scmp.lt.s32.totalorder (!%p437_p2), %s1335_s19, 2 }
   0x6   : > { %440 = sbr.rel (%p437_p2) target bundleno = 1561 (0x619), region = 80  ;;  %1470 = vmatprep.subr.bf16.mxu0 (!%p437_p2), %v1684_v1  ;;  %1490 = vmatprep.subr.bf16.mxu1 (!%p437_p2), %v1684_v1  ;;  %v1628_v4 = vld [vmem:[%s2049_s3] sm:$0xff] (!%p437_p2)   ;;  %v1623_v5 = vld [vmem:[%s2047_s1 + $0x18] sm:$0xff] (!%p437_p2)   ;;  %v1629_v6 = vld [vmem:[%s2049_s3 + $0x8] sm:$0xff] (!%p437_p2)  }
   0x7   : > { %1471 = vmatpush3.bf16.msra.mxu0 (!%p437_p2), %v1620_v0  ;;  %1486 = vmatprep.mubr.msk.bf16.mxu0 (!%p437_p2), %vm1685_vm0, %v1684_v1  ;;  %v1624_v7 = vld [vmem:[%s2047_s1 + $0x20] sm:$0xff] (!%p437_p2)   ;;  %v1630_v8 = vld [vmem:[%s2049_s3 + $0x10] sm:$0xff] (!%p437_p2)   ;;  %v1625_v9 = vld [vmem:[%s2047_s1 + $0x28] sm:$0xff] (!%p437_p2)  }
   0x8   : > { %1472 = vmatprep.subr.bf16.mxu0 (!%p437_p2), %v1684_v1  ;;  %1506 = vmatprep.mubr.msk.bf16.mxu1 (!%p437_p2), %vm1685_vm0, %v1684_v1  ;;  %v1631_v10 = vld [vmem:[%s2049_s3 + $0x18] sm:$0xff] (!%p437_p2)   ;;  %v1626_v11 = vld [vmem:[%s2047_s1 + $0x30] sm:$0xff] (!%p437_p2)   ;;  %v1632_v12 = vld [vmem:[%s2049_s3 + $0x20] sm:$0xff] (!%p437_p2)  }
   0x9   : > { %1491 = vmatpush3.bf16.msra.mxu1 (!%p437_p2), %v1628_v4  ;;  %v1627_v13 = vld [vmem:[%s2047_s1 + $0x38] sm:$0xff] (!%p437_p2)   ;;  %v1633_v14 = vld [vmem:[%s2049_s3 + $0x28] sm:$0xff] (!%p437_p2)   ;;  %v1634_v16 = vld [vmem:[%s2049_s3 + $0x30] sm:$0xff] (!%p437_p2)  }
   0xa   : > { %1492 = vmatprep.subr.bf16.mxu1 (!%p437_p2), %v1684_v1  ;;  %v1635_v17 = vld [vmem:[%s2049_s3 + $0x38] sm:$0xff] (!%p437_p2)   ;;  %v1636_v18 = vld [vmem:[%s2051_s5] sm:$0xff] (!%p437_p2)   ;;  %v1637_v19 = vld [vmem:[%s2051_s5 + $0x8] sm:$0xff] (!%p437_p2)  }
   0xb   : > { %1473 = vmatpush3.bf16.msra.mxu0 (!%p437_p2), %v1621_v2  ;;  %v1638_v20 = vld [vmem:[%s2051_s5 + $0x10] sm:$0xff] (!%p437_p2)   ;;  %v1639_v21 = vld [vmem:[%s2051_s5 + $0x18] sm:$0xff] (!%p437_p2)   ;;  %v1640_v22 = vld [vmem:[%s2051_s5 + $0x20] sm:$0xff] (!%p437_p2)  }
   0xc   : > { %1474 = vmatprep.subr.bf16.mxu0 (!%p437_p2), %v1684_v1  ;;  %v1641_v23 = vld [vmem:[%s2051_s5 + $0x28] sm:$0xff] (!%p437_p2)   ;;  %v1342_v24 = vld [vmem:[%s2048_s2] ss:$0 sm:$0xff] (!%p437_p2)  ;;  %v1642_v32 = vld [vmem:[%s2051_s5 + $0x30] sm:$0xff] (!%p437_p2)  }
   0xd   : > { %s2063_s19 = smov (!%p482_p3, %s1335_s19), 2  ;;  %1493 = vmatpush3.bf16.msra.mxu1 %v1629_v6  ;;  %v1643_v33 = vld [vmem:[%s2051_s5 + $0x38] sm:$0xff]   ;;  %v1644_v34 = vld [vmem:[%s2053_s7] sm:$0xff]   ;;  %v1645_v35 = vld [vmem:[%s2053_s7 + $0x8] sm:$0xff]  }
   0xe   : > { %s1340_s21 = sshll.u32 %s2063_s19, 2  ;;  %1494 = vmatprep.subr.bf16.mxu1 %v1684_v1  ;;  %v1646_v36 = vld [vmem:[%s2053_s7 + $0x10] sm:$0xff]   ;;  %v1647_v37 = vld [vmem:[%s2053_s7 + $0x18] sm:$0xff]   ;;  %v1648_v38 = vld [vmem:[%s2053_s7 + $0x20] sm:$0xff]   ;;  %s1341_s16 = sshll.u32 %s2063_s19, 3 }
   0xf   : > { %1475 = vmatpush3.bf16.msra.mxu0 %v1622_v3  ;;  %s485_s24 = scalar_lea.vmem %s2046_s0, %s1340_s21  ;;  %v1649_v39 = vld [vmem:[%s2053_s7 + $0x28] sm:$0xff]   ;;  %v1351_v40 = vld [vmem:[%s2050_s4] ss:$0 sm:$0xff]  ;;  %v1650_v48 = vld [vmem:[%s2053_s7 + $0x30] sm:$0xff]  }
  0x10   : > { %1476 = vmatprep.subr.bf16.mxu0 %v1684_v1  ;;  %v491_v15 = vld [vmem:[%s485_s24] sm:$0xf]  ;;  %v1651_v49 = vld [vmem:[%s2053_s7 + $0x38] sm:$0xff]   ;;  %v1653_v51 = vld [vmem:[%s2055_s9 + $0x8] sm:$0xff]   ;;  %s489_s24 = scalar_lea.vmem %s2061_s15, %s1341_s16 }
  0x11   : > { %1495 = vmatpush3.bf16.msra.mxu1 %v1630_v8  ;;  %v1652_v50 = vld [vmem:[%s2055_s9] sm:$0xff]   ;;  %v1654_v52 = vld [vmem:[%s2055_s9 + $0x10] sm:$0xff]   ;;  %v1655_v53 = vld [vmem:[%s2055_s9 + $0x18] sm:$0xff]  }
  0x12   : > { %1496 = vmatprep.subr.bf16.mxu1 %v1684_v1  ;;  %v1656_v54 = vld [vmem:[%s2055_s9 + $0x20] sm:$0xff]   ;;  %v1657_v55 = vld [vmem:[%s2055_s9 + $0x28] sm:$0xff]   ;;  %v1658_v0 = vld [vmem:[%s2055_s9 + $0x30] sm:$0xff]  }
  0x13   : > { %1477 = vmatpush3.bf16.msra.mxu0 %v1623_v5  ;;  %v1360_v56 = vld [vmem:[%s2052_s6] ss:$0 sm:$0xff]  ;;  %v1659_v2 = vld [vmem:[%s2055_s9 + $0x38] sm:$0xff]   ;;  %v1661_v4 = vld [vmem:[%s2057_s11 + $0x8] sm:$0xff]  }
  0x14   : > { %1478 = vmatprep.subr.bf16.mxu0 %v1684_v1  ;;  %v1660_v3 = vld [vmem:[%s2057_s11] sm:$0xff]   ;;  %v1662_v5 = vld [vmem:[%s2057_s11 + $0x10] sm:$0xff]   ;;  %v1663_v6 = vld [vmem:[%s2057_s11 + $0x18] sm:$0xff]  }
  0x15   : > { %1497 = vmatpush3.bf16.msra.mxu1 %v1631_v10  ;;  %v1665_v8 = vld [vmem:[%s2057_s11 + $0x28] sm:$0xff]  }
  0x16   : > { %1498 = vmatprep.subr.bf16.mxu1 %v1684_v1 }
  0x17   : > { %1479 = vmatpush3.bf16.msra.mxu0 %v1624_v7  ;;  %v1664_v7 = vld [vmem:[%s2057_s11 + $0x20] sm:$0xff]  }
  0x18   : > { %1480 = vmatprep.subr.bf16.mxu0 %v1684_v1 }
  0x19   : > { %1499 = vmatpush3.bf16.msra.mxu1 %v1632_v12 }
  0x1a   : > { %1500 = vmatprep.subr.bf16.mxu1 %v1684_v1 }
  0x1b   : > { %1481 = vmatpush3.bf16.msra.mxu0 %v1625_v9  ;;  %v1369_v9 = vld [vmem:[%s2054_s8] ss:$0 sm:$0xff] }
  0x1c   : > { %1482 = vmatprep.subr.bf16.mxu0 %v1684_v1 }
  0x1d   : > { %1501 = vmatpush3.bf16.msra.mxu1 %v1633_v14 }
  0x1e   : > { %1502 = vmatprep.subr.bf16.mxu1 %v1684_v1 }
  0x1f   : > { %1483 = vmatpush3.bf16.msra.mxu0 %v1626_v11 }
  0x20   : > { %1484 = vmatprep.subr.bf16.mxu0 %v1684_v1 }
  0x21   : > { %1503 = vmatpush3.bf16.msra.mxu1 %v1634_v16 }
  0x22   : > { %1504 = vmatprep.subr.bf16.mxu1 %v1684_v1 }
  0x23   : > { %1485 = vmatpush3.bf16.msra.mxu0 %v1627_v13 }
  0x24   : > { %1510 = vmatprep.subr.bf16.mxu0 %v1684_v1 }
  0x25   : > { %1505 = vmatpush3.bf16.msra.mxu1 %v1635_v17  ;;  %v1666_v17 = vld [vmem:[%s2057_s11 + $0x30] sm:$0xff]  }
  0x26   : > { %1487 = vmatmul.mubr.bf16.vlgmr.msra.gmra.mrb[0].mxu0 %v491_v15  ;;  %1530 = vmatprep.subr.bf16.mxu1 %v1684_v1 }
  0x27   : > { %1526 = vmatprep.mubr.msk.bf16.mxu0 %vm1685_vm0, %v1684_v1  ;;  %1511 = vmatpush3.bf16.msra.mxu0 %v1636_v18  ;;  %v1667_v18 = vld [vmem:[%s2057_s11 + $0x38] sm:$0xff]  }
  0x28   : > { %1512 = vmatprep.subr.bf16.mxu0 %v1684_v1 }
  0x2b   : > { %1513 = vmatpush3.bf16.msra.mxu0 %v1637_v19  ;;  %v1668_v19 = vld [vmem:[%s2059_s13] sm:$0xff]  }
  0x2c   : > { %1514 = vmatprep.subr.bf16.mxu0 %v1684_v1 }
  0x2f   : > { %1515 = vmatpush3.bf16.msra.mxu0 %v1638_v20  ;;  %v1669_v20 = vld [vmem:[%s2059_s13 + $0x8] sm:$0xff]  }
  0x30   : > { %1516 = vmatprep.subr.bf16.mxu0 %v1684_v1 }
  0x33   : > { %1517 = vmatpush3.bf16.msra.mxu0 %v1639_v21  ;;  %v1670_v21 = vld [vmem:[%s2059_s13 + $0x10] sm:$0xff]  }
  0x34   : > { %1518 = vmatprep.subr.bf16.mxu0 %v1684_v1 }
  0x37   : > { %1519 = vmatpush3.bf16.msra.mxu0 %v1640_v22  ;;  %v1671_v22 = vld [vmem:[%s2059_s13 + $0x18] sm:$0xff]  }
  0x38   : > { %1520 = vmatprep.subr.bf16.mxu0 %v1684_v1 }
  0x3b   : > { %1521 = vmatpush3.bf16.msra.mxu0 %v1641_v23  ;;  %v1672_v23 = vld [vmem:[%s2059_s13 + $0x20] sm:$0xff]  }
  0x3c   : > { %1522 = vmatprep.subr.bf16.mxu0 %v1684_v1 }
  0x3f   : > { %1523 = vmatpush3.bf16.msra.mxu0 %v1642_v32 }
  0x40   : > { %1524 = vmatprep.subr.bf16.mxu0 %v1684_v1 }
  0x43   : > { %1525 = vmatpush3.bf16.msra.mxu0 %v1643_v33  ;;  %v1674_v33 = vld [vmem:[%s2059_s13 + $0x30] sm:$0xff]  }
  0x44   : > { %1550 = vmatprep.subr.bf16.mxu0 %v1684_v1 }
  0xf9   : > { %v597_v25 = vpop.f32.mrb[0].mxu0 }
  0xfa   : > { %v598_v26 = vadd.f32 %v1342_v24, %v597_v25  ;;  %v1488_v27 = vpop.f32.mrb[1].mxu0  ;;  %v1673_v24 = vld [vmem:[%s2059_s13 + $0x28] sm:$0xff]   ;;  %v1378_v25 = vld [vmem:[%s2056_s10] ss:$0 sm:$0xff] }
  0xfb   : > { %v600_v28 = vpop.f32.mrb[2].mxu0 }
  0xfc   : > { %v603_v29 = vmax.f32 %v598_v26, 0.0  ;;  %v1489_v30 = vpop.f32.mrb[3].mxu0 }
  0xfe   : > { %v604_v31 = vpack.c.bf16 %v603_v29, %v603_v29 }
 0x100   : > { %1507 = vmatmul.mubr.bf16.vlgmr.msra.gmra.mrb[0].mxu1 %v604_v31 }
 0x101   : > { %1546 = vmatprep.mubr.msk.bf16.mxu1 %vm1685_vm0, %v1684_v1  ;;  %1531 = vmatpush3.bf16.msra.mxu1 %v1644_v34  ;;  %v1675_v34 = vld [vmem:[%s2059_s13 + $0x38] sm:$0xff]  }
 0x102   : > { %1532 = vmatprep.subr.bf16.mxu1 %v1684_v1 }
 0x105   : > { %1533 = vmatpush3.bf16.msra.mxu1 %v1645_v35  ;;  %v1387_v35 = vld [vmem:[%s2058_s12] ss:$0 sm:$0xff] }
 0x106   : > { %1534 = vmatprep.subr.bf16.mxu1 %v1684_v1 }
 0x109   : > { %1535 = vmatpush3.bf16.msra.mxu1 %v1646_v36 }
 0x10a   : > { %1536 = vmatprep.subr.bf16.mxu1 %v1684_v1 }
 0x10d   : > { %1537 = vmatpush3.bf16.msra.mxu1 %v1647_v37 }
 0x10e   : > { %1538 = vmatprep.subr.bf16.mxu1 %v1684_v1 }
 0x111   : > { %1539 = vmatpush3.bf16.msra.mxu1 %v1648_v38 }
 0x112   : > { %1540 = vmatprep.subr.bf16.mxu1 %v1684_v1 }
 0x115   : > { %1541 = vmatpush3.bf16.msra.mxu1 %v1649_v39 }
 0x116   : > { %1542 = vmatprep.subr.bf16.mxu1 %v1684_v1 }
 0x119   : > { %1543 = vmatpush3.bf16.msra.mxu1 %v1650_v48 }
 0x11a   : > { %1544 = vmatprep.subr.bf16.mxu1 %v1684_v1 }
 0x11d   : > { %1545 = vmatpush3.bf16.msra.mxu1 %v1651_v49 }
 0x11e   : > { %1570 = vmatprep.subr.bf16.mxu1 %v1684_v1 }
 0x1d3   : > { %v710_v41 = vpop.f32.mrb[0].mxu1 }
 0x1d4   : > { %v711_v42 = vadd.f32 %v1351_v40, %v710_v41  ;;  %v1508_v43 = vpop.f32.mrb[1].mxu1 }
 0x1d5   : > { %v713_v44 = vpop.f32.mrb[2].mxu1 }
 0x1d6   : > { %v716_v45 = vmax.f32 %v711_v42, 0.0  ;;  %v1509_v46 = vpop.f32.mrb[3].mxu1 }
 0x1d8   : > { %v717_v47 = vpack.c.bf16 %v716_v45, %v716_v45 }
 0x1da   : > { %1527 = vmatmul.mubr.bf16.vlgmr.msra.gmra.mrb[4].mxu0 %v717_v47 }
 0x1db   : > { %1566 = vmatprep.mubr.msk.bf16.mxu0 %vm1685_vm0, %v1684_v1  ;;  %1551 = vmatpush3.bf16.msra.mxu0 %v1652_v50 }
 0x1dc   : > { %1552 = vmatprep.subr.bf16.mxu0 %v1684_v1 }
 0x1df   : > { %1553 = vmatpush3.bf16.msra.mxu0 %v1653_v51 }
 0x1e0   : > { %1554 = vmatprep.subr.bf16.mxu0 %v1684_v1 }
 0x1e3   : > { %1555 = vmatpush3.bf16.msra.mxu0 %v1654_v52 }
 0x1e4   : > { %1556 = vmatprep.subr.bf16.mxu0 %v1684_v1 }
 0x1e7   : > { %1557 = vmatpush3.bf16.msra.mxu0 %v1655_v53 }
 0x1e8   : > { %1558 = vmatprep.subr.bf16.mxu0 %v1684_v1 }
 0x1eb   : > { %1559 = vmatpush3.bf16.msra.mxu0 %v1656_v54 }
 0x1ec   : > { %1560 = vmatprep.subr.bf16.mxu0 %v1684_v1 }
 0x1ef   : > { %1561 = vmatpush3.bf16.msra.mxu0 %v1657_v55 }
 0x1f0   : > { %1562 = vmatprep.subr.bf16.mxu0 %v1684_v1 }
 0x1f3   : > { %1563 = vmatpush3.bf16.msra.mxu0 %v1658_v0 }
 0x1f4   : > { %1564 = vmatprep.subr.bf16.mxu0 %v1684_v1 }
 0x1f7   : > { %1565 = vmatpush3.bf16.msra.mxu0 %v1659_v2 }
 0x1f8   : > { %1590 = vmatprep.subr.bf16.mxu0 %v1684_v1 }
 0x2ad   : > { %v823_v57 = vpop.f32.mrb[4].mxu0 }
 0x2ae   : > { %v824_v58 = vadd.f32 %v1360_v56, %v823_v57  ;;  %v1528_v59 = vpop.f32.mrb[5].mxu0 }
 0x2af   : > { %v826_v60 = vpop.f32.mrb[6].mxu0 }
 0x2b0   : > { %v829_v61 = vmax.f32 %v824_v58, 0.0  ;;  %v1529_v62 = vpop.f32.mrb[7].mxu0 }
 0x2b2   : > { %v830_v63 = vpack.c.bf16 %v829_v61, %v829_v61 }
 0x2b4   : > { %1547 = vmatmul.mubr.bf16.vlgmr.msra.gmra.mrb[4].mxu1 %v830_v63 }
 0x2b5   : > { %1586 = vmatprep.mubr.msk.bf16.mxu1 %vm1685_vm0, %v1684_v1  ;;  %1571 = vmatpush3.bf16.msra.mxu1 %v1660_v3 }
 0x2b6   : > { %1572 = vmatprep.subr.bf16.mxu1 %v1684_v1 }
 0x2b9   : > { %1573 = vmatpush3.bf16.msra.mxu1 %v1661_v4 }
 0x2ba   : > { %1574 = vmatprep.subr.bf16.mxu1 %v1684_v1 }
 0x2bd   : > { %1575 = vmatpush3.bf16.msra.mxu1 %v1662_v5 }
 0x2be   : > { %1576 = vmatprep.subr.bf16.mxu1 %v1684_v1 }
 0x2c1   : > { %1577 = vmatpush3.bf16.msra.mxu1 %v1663_v6 }
 0x2c2   : > { %1578 = vmatprep.subr.bf16.mxu1 %v1684_v1 }
 0x2c5   : > { %1579 = vmatpush3.bf16.msra.mxu1 %v1664_v7 }
 0x2c6   : > { %1580 = vmatprep.subr.bf16.mxu1 %v1684_v1 }
 0x2c9   : > { %1581 = vmatpush3.bf16.msra.mxu1 %v1665_v8 }
 0x2ca   : > { %1582 = vmatprep.subr.bf16.mxu1 %v1684_v1 }
 0x2cd   : > { %1583 = vmatpush3.bf16.msra.mxu1 %v1666_v17 }
 0x2ce   : > { %1584 = vmatprep.subr.bf16.mxu1 %v1684_v1 }
 0x2d1   : > { %1585 = vmatpush3.bf16.msra.mxu1 %v1667_v18 }
 0x387   : > { %v936_v10 = vpop.f32.mrb[4].mxu1 }
 0x388   : > { %v937_v11 = vadd.f32 %v1369_v9, %v936_v10  ;;  %v1548_v12 = vpop.f32.mrb[5].mxu1 }
 0x389   : > { %v939_v13 = vpop.f32.mrb[6].mxu1 }
 0x38a   : > { %v942_v14 = vmax.f32 %v937_v11, 0.0  ;;  %v1549_v15 = vpop.f32.mrb[7].mxu1 }
 0x38c   : > { %v943_v16 = vpack.c.bf16 %v942_v14, %v942_v14 }
 0x38e   : > { %1567 = vmatmul.mubr.bf16.vlgmr.msra.gmra.mrb[8].mxu0 %v943_v16 }
 0x38f   : > { %1606 = vmatprep.mubr.msk.bf16.mxu0 %vm1685_vm0, %v1684_v1  ;;  %1591 = vmatpush3.bf16.msra.mxu0 %v1668_v19 }
 0x390   : > { %1592 = vmatprep.subr.bf16.mxu0 %v1684_v1 }
 0x393   : > { %1593 = vmatpush3.bf16.msra.mxu0 %v1669_v20 }
 0x394   : > { %1594 = vmatprep.subr.bf16.mxu0 %v1684_v1 }
 0x397   : > { %1595 = vmatpush3.bf16.msra.mxu0 %v1670_v21 }
 0x398   : > { %1596 = vmatprep.subr.bf16.mxu0 %v1684_v1 }
 0x39b   : > { %1597 = vmatpush3.bf16.msra.mxu0 %v1671_v22 }
 0x39c   : > { %1598 = vmatprep.subr.bf16.mxu0 %v1684_v1 }
 0x39f   : > { %1599 = vmatpush3.bf16.msra.mxu0 %v1672_v23 }
 0x3a0   : > { %1600 = vmatprep.subr.bf16.mxu0 %v1684_v1 }
 0x3a3   : > { %1601 = vmatpush3.bf16.msra.mxu0 %v1673_v24 }
 0x3a4   : > { %1602 = vmatprep.subr.bf16.mxu0 %v1684_v1 }
 0x3a7   : > { %1603 = vmatpush3.bf16.msra.mxu0 %v1674_v33 }
 0x3a8   : > { %1604 = vmatprep.subr.bf16.mxu0 %v1684_v1  ;;  %v1396_v1 = vld [vmem:[%s2060_s14] ss:$0 sm:$0xff] }
 0x3ab   : > { %1605 = vmatpush3.bf16.msra.mxu0 %v1675_v34 }
 0x461   : > { %v1049_v26 = vpop.f32.mrb[8].mxu0 }
 0x462   : > { %v1050_v27 = vadd.f32 %v1378_v25, %v1049_v26  ;;  %v1568_v28 = vpop.f32.mrb[9].mxu0 }
 0x463   : > { %v1052_v29 = vpop.f32.mrb[10].mxu0 }
 0x464   : > { %v1055_v30 = vmax.f32 %v1050_v27, 0.0  ;;  %v1569_v31 = vpop.f32.mrb[11].mxu0 }
 0x466   : > { %v1056_v32 = vpack.c.bf16 %v1055_v30, %v1055_v30 }
 0x468   : > { %1587 = vmatmul.mubr.bf16.vlgmr.msra.gmra.mrb[8].mxu1 %v1056_v32 }
 0x53b   : > { %v1162_v36 = vpop.f32.mrb[8].mxu1 }
 0x53c   : > { %v1163_v37 = vadd.f32 %v1387_v35, %v1162_v36  ;;  %v1588_v38 = vpop.f32.mrb[9].mxu1 }
 0x53d   : > { %v1165_v39 = vpop.f32.mrb[10].mxu1 }
 0x53e   : > { %v1168_v40 = vmax.f32 %v1163_v37, 0.0  ;;  %v1589_v41 = vpop.f32.mrb[11].mxu1 }
 0x540   : > { %v1169_v42 = vpack.c.bf16 %v1168_v40, %v1168_v40 }
 0x542   : > { %1607 = vmatmul.mubr.bf16.vlgmr.msra.gmra.mrb[12].mxu0 %v1169_v42 }
 0x615   : > { %v1275_v43 = vpop.f32.mrb[12].mxu0 }
 0x616   : > { %v1276_v44 = vadd.f32 %v1396_v1, %v1275_v43  ;;  %v1608_v45 = vpop.f32.mrb[13].mxu0 }
 0x617   : > { %v1278_v46 = vpop.f32.mrb[14].mxu0 }
 0x618   : > { %1281 = vst [vmem:[%s489_s24] sm:$0xff] %v1276_v44  ;;  %v1609_v47 = vpop.f32.mrb[15].mxu0 }
 0x619 PF: > { %s25_s18 = sadd.s32 1, %s1682_s18  }
 0x61a   : > { %p22_p4 = scmp.ge.s32.totalorder %s25_s18, 5  }
 0x61c   :  { %24 = sbr.rel (!%p22_p4) target bundleno = 1 (0x1), region = 110 }

</bundles_post_ra>
